<compile_context>
chip_gen: v7x
topology: tpu7x:2x2x1
jax: 0.10.0
libtpu: 0.0.40
codegen_flags: <defaults>
</compile_context>

<pallas_src>
import functools

import jax
import jax.numpy as jnp
from jax.experimental import pallas as pl
from jax.experimental.pallas import tpu as pltpu

LANE = 128


def _round_up(x, m):
    return (x + m - 1) // m * m


def _pick_block_batch(B, HW, Kpad, Cpad, *, vmem_budget_bytes=24 << 20, max_bt=64):
    """Pick how many batch elements to process per grid step.

    Budget: double-buffered bf16 patch block + single f32 conv intermediate.
    Keep >= 2 grid steps when B allows so both v7x TensorCores get work.
    """
    per_elem = 2 * HW * Kpad * 2 + HW * Cpad * 4
    bt = max(1, min(max_bt, vmem_budget_bytes // per_elem, B))
    if B >= 2:
        bt = min(bt, max(1, B // 2))
    return max(1, bt)


# ----------------------------- Pallas kernel -------------------------------

def _student_forward_kernel(patches_ref, wconv_ref, bconv_ref, wfc_ref, bfc_ref,
                            logits_ref, feat_ref, *, inv_hw):
    # patches_ref: (Bt, HW, Kpad)   bf16  -- Bt images' im2col rows
    # wconv_ref:   (Kpad, Cpad)     bf16
    # bconv_ref:   (1, Cpad)        f32
    # wfc_ref:     (Cpad, NCpad)    bf16
    # bfc_ref:     (1, NCpad)       f32
    bt, hw, kpad = patches_ref.shape
    cpad = wconv_ref.shape[1]

    # Conv as one big GEMM over all Bt*HW patch rows (MXU, f32 accumulation).
    # The reshape only relabels leading dims (layout-free: HW % 8 == 0, Kpad = 128k).
    patches = patches_ref[...].reshape(bt * hw, kpad)
    conv = jnp.dot(patches, wconv_ref[...],
                   preferred_element_type=jnp.float32)           # (Bt*HW, Cpad) f32
    conv = jnp.maximum(conv + bconv_ref[...], 0.0)               # bias + ReLU (VPU, f32)

    # Global average pool = per-element sublane reduction (XLU), scaled by 1/HW.
    # TODO(synk): at production HW, stream this reduction over HW chunks into a
    # small f32 scratch instead of materializing the full (Bt*HW, Cpad) f32 tile.
    pooled = conv.reshape(bt, hw, cpad).sum(axis=1) * inv_hw     # (Bt, Cpad) f32

    # Batched classifier GEMM: (Bt, Cpad) @ (Cpad, NCpad) + bias.
    logits = jnp.dot(pooled.astype(jnp.bfloat16), wfc_ref[...],
                     preferred_element_type=jnp.float32) + bfc_ref[...]

    logits_ref[0] = logits                                       # (Bt, NCpad)
    feat_ref[0] = pooled                                         # (Bt, Cpad)


def student_forward_pallas(patches, w_conv, b_conv, w_fc, b_fc, *, inv_hw):
    """patches: (B, HW, Kpad) bf16; lane-padded weights/biases; returns padded outputs."""
    B, HW, Kpad = patches.shape
    Cpad = w_conv.shape[1]
    NCpad = w_fc.shape[1]

    Bt = _pick_block_batch(B, HW, Kpad, Cpad)
    G = -(-B // Bt)                       # ceil(B / Bt) grid steps
    Bpad = G * Bt
    if Bpad != B:
        # Zero-pad the batch; padded rows produce harmless rows that are sliced off.
        patches = jnp.pad(patches, ((0, Bpad - B), (0, 0), (0, 0)))

    kernel = functools.partial(_student_forward_kernel, inv_hw=inv_hw)

    flops = 2 * Bpad * HW * Kpad * Cpad + 2 * Bpad * Cpad * NCpad
    bytes_accessed = (Bpad * HW * Kpad * 2                 # bf16 patches
                      + (Kpad * Cpad + Cpad * NCpad) * 2   # bf16 weights
                      + (Cpad + NCpad) * 4                 # f32 biases
                      + Bpad * (NCpad + Cpad) * 4)         # f32 outputs

    logits_p, feat_p = pl.pallas_call(
        kernel,
        out_shape=(
            jax.ShapeDtypeStruct((G, Bt, NCpad), jnp.float32),
            jax.ShapeDtypeStruct((G, Bt, Cpad), jnp.float32),
        ),
        grid=(G,),
        in_specs=[
            # Streamed operand.
            # TODO(synk): if the patch DMA is still exposed at production sizes,
            # set pipeline_mode=pl.Buffered(3) on this spec only.
            pl.BlockSpec((Bt, HW, Kpad), lambda b: (b, 0, 0)),
            # Weights / biases: constant index_map -> stay resident in VMEM.
            pl.BlockSpec((Kpad, Cpad), lambda b: (0, 0)),
            pl.BlockSpec((1, Cpad), lambda b: (0, 0)),
            pl.BlockSpec((Cpad, NCpad), lambda b: (0, 0)),
            pl.BlockSpec((1, NCpad), lambda b: (0, 0)),
        ],
        out_specs=(
            pl.BlockSpec((1, Bt, NCpad), lambda b: (b, 0, 0)),
            pl.BlockSpec((1, Bt, Cpad), lambda b: (b, 0, 0)),
        ),
        compiler_params=pltpu.CompilerParams(
            dimension_semantics=("parallel",),
            vmem_limit_bytes=32 * 1024 * 1024,   # safe on v5e/v6e/v7x
        ),
        cost_estimate=pl.CostEstimate(
            flops=flops, transcendentals=0, bytes_accessed=bytes_accessed),
    )(patches, w_conv, b_conv, w_fc, b_fc)

    logits = logits_p.reshape(Bpad, NCpad)[:B]
    feat = feat_p.reshape(Bpad, Cpad)[:B]
    return logits, feat


# ------------------------------ JAX glue ------------------------------------

def _im2col_nchw(x, k=3, pad=1):
    """x: (B, C, H, W) -> patches (B, H*W, C*k*k), 'same' padding, stride 1."""
    B, C, H, W = x.shape
    xp = jnp.pad(x, ((0, 0), (0, 0), (pad, pad), (pad, pad)))
    cols = []
    for di in range(k):
        for dj in range(k):
            cols.append(xp[:, :, di:di + H, dj:dj + W])     # (B, C, H, W)
    patches = jnp.stack(cols, axis=2)                       # (B, C, k*k, H, W)
    patches = patches.transpose(0, 3, 4, 1, 2)              # (B, H, W, C, k*k)
    return patches.reshape(B, H * W, C * k * k)


@functools.partial(jax.jit, static_argnames=("k", "c_mid", "num_classes", "kpad"))
def _student_apply(image, w_conv_p, b_conv_p, w_fc_p, b_fc_p, *,
                   k, c_mid, num_classes, kpad):
    B, C, H, W = image.shape
    hw = H * W
    kdim = C * k * k
    # Cast to bf16 BEFORE im2col / K-padding so the 9x-expanded patch tensor and
    # its zero pad are half-width in HBM.
    # TODO(synk): at production channel counts, fuse im2col into the kernel
    # (load the raw padded image tile and accumulate 9 shifted GEMMs) to remove
    # the 9x HBM materialization entirely.
    patches = _im2col_nchw(image.astype(jnp.bfloat16), k=k, pad=k // 2)  # (B, HW, kdim) bf16
    patches = jnp.pad(patches, ((0, 0), (0, 0), (0, kpad - kdim)))       # lane-pad K
    logits_p, feat_p = student_forward_pallas(
        patches, w_conv_p, b_conv_p, w_fc_p, b_fc_p, inv_hw=1.0 / hw)
    return logits_p[:, :num_classes], feat_p[:, :c_mid]


class SyntheticStudent:
    """Deterministic tiny CNN student: conv3x3 -> relu -> gap -> linear.

    Returns (logits, features) like mdistiller students.
    """

    def __init__(self, c_in=4, c_mid=8, num_classes=10, k=3, seed=0):
        self.c_in, self.c_mid, self.num_classes, self.k = c_in, c_mid, num_classes, k
        key = jax.random.PRNGKey(seed)
        k1, k2, k3, k4 = jax.random.split(key, 4)
        kdim = c_in * k * k
        # f32 reference weights (conv weight already flattened for the GEMM).
        self.w_conv = (jax.random.normal(k1, (kdim, c_mid), jnp.float32)
                       * (1.0 / kdim ** 0.5))
        self.b_conv = jax.random.normal(k2, (c_mid,), jnp.float32) * 0.01
        self.w_fc = (jax.random.normal(k3, (c_mid, num_classes), jnp.float32)
                     * (1.0 / c_mid ** 0.5))
        self.b_fc = jax.random.normal(k4, (num_classes,), jnp.float32) * 0.01

        # Lane-padded (multiples of 128) copies used by the Pallas kernel.
        self.kpad = _round_up(kdim, LANE)
        self.cpad = _round_up(c_mid, LANE)
        self.ncpad = _round_up(num_classes, LANE)
        self.w_conv_p = jnp.zeros((self.kpad, self.cpad), jnp.bfloat16
                                  ).at[:kdim, :c_mid].set(self.w_conv.astype(jnp.bfloat16))
        self.b_conv_p = jnp.zeros((1, self.cpad), jnp.float32
                                  ).at[0, :c_mid].set(self.b_conv)
        self.w_fc_p = jnp.zeros((self.cpad, self.ncpad), jnp.bfloat16
                                ).at[:c_mid, :num_classes].set(self.w_fc.astype(jnp.bfloat16))
        self.b_fc_p = jnp.zeros((1, self.ncpad), jnp.float32
                                ).at[0, :num_classes].set(self.b_fc)

    def __call__(self, image):
        # image: NCHW float32 (like the PyTorch module).
        assert image.shape[1] == self.c_in
        return _student_apply(
            image, self.w_conv_p, self.b_conv_p, self.w_fc_p, self.b_fc_p,
            k=self.k, c_mid=self.c_mid, num_classes=self.num_classes,
            kpad=self.kpad)


class Distiller:
    """JAX/Pallas mirror of the mdistiller Distiller base class."""

    def __init__(self, student, teacher):
        self.student = student
        self.teacher = teacher
        self.training = True

    def train(self, mode=True):
        if not isinstance(mode, bool):
            raise ValueError('training mode is expected to be boolean')
        self.training = mode
        return self

    def eval(self):
        return self.train(False)

    def get_learnable_parameters(self):
        return [self.student.w_conv, self.student.b_conv,
                self.student.w_fc, self.student.b_fc]

    def get_extra_parameters(self):
        return 0

    def forward_train(self, **kwargs):
        # Base class defines no training-time loss; subclasses implement it.
        raise NotImplementedError()

    def forward_test(self, image):
        return self.student(image)[0]

    def forward(self, **kwargs):
        if self.training:
            return self.forward_train(**kwargs)
        return self.forward_test(kwargs['image'])

    __call__ = forward


def _reference_forward(image, student):
    """Pure-JAX f32 reference of the student's logits for correctness checking."""
    patches = _im2col_nchw(image, k=student.k, pad=student.k // 2)   # (B, HW, K)
    conv = jnp.maximum(
        jnp.einsum('bpk,kc->bpc', patches, student.w_conv) + student.b_conv, 0.0)
    pooled = conv.mean(axis=1)                                       # (B, C_mid)
    return pooled @ student.w_fc + student.b_fc


# ------------------------------- main ---------------------------------------

if __name__ == "__main__":
    key = jax.random.PRNGKey(0)
    B, C, H, W = 2, 4, 16, 16
    image = jax.random.normal(key, (B, C, H, W), jnp.float32)   # NCHW like PyTorch

    student = SyntheticStudent(c_in=C, c_mid=8, num_classes=10, seed=0)
    teacher = SyntheticStudent(c_in=C, c_mid=8, num_classes=10, seed=1)

    distiller = Distiller(student, teacher).eval()   # eval mode -> forward_test
    logits = distiller(image=image)
    logits = jax.block_until_ready(logits)

    assert logits.shape == (B, 10) and logits.dtype == jnp.float32
    assert bool(jnp.all(jnp.isfinite(logits)))

    ref = _reference_forward(image, student)
    max_err = float(jnp.max(jnp.abs(logits - ref)))
    assert jnp.allclose(logits, ref, rtol=5e-2, atol=5e-2), max_err

    print("KERNEL_OK")
</pallas_src>

<mosaic_0001>
module attributes {stable_mosaic.version = 11 : i64} {
  func.func @_student_forward_kernel(%arg0: i32, %arg1: memref<1x256x128xbf16, #tpu.memory_space<vmem>>, %arg2: memref<128x128xbf16, #tpu.memory_space<vmem>>, %arg3: memref<1x128xf32, #tpu.memory_space<vmem>>, %arg4: memref<128x128xbf16, #tpu.memory_space<vmem>>, %arg5: memref<1x128xf32, #tpu.memory_space<vmem>>, %arg6: memref<1x1x128xf32, #tpu.memory_space<vmem>>, %arg7: memref<1x1x128xf32, #tpu.memory_space<vmem>>) attributes {dimension_semantics = [#tpu.dimension_semantics<parallel>], iteration_bounds = array<i64: 2>, scalar_prefetch = 0 : i64, scratch_operands = 0 : i64, tpu.core_type = #tpu.core_type<tc>, window_params = [{transform_indices = @transform_0, window_bounds = array<i64: 1, 256, 128>}, {pipeline_mode = #tpu.pipeline_mode<synchronous>, transform_indices = @transform_1, window_bounds = array<i64: 128, 128>}, {pipeline_mode = #tpu.pipeline_mode<synchronous>, transform_indices = @transform_2, window_bounds = array<i64: 1, 128>}, {pipeline_mode = #tpu.pipeline_mode<synchronous>, transform_indices = @transform_3, window_bounds = array<i64: 128, 128>}, {pipeline_mode = #tpu.pipeline_mode<synchronous>, transform_indices = @transform_4, window_bounds = array<i64: 1, 128>}, {transform_indices = @transform_5, window_bounds = array<i64: 1, 1, 128>}, {transform_indices = @transform_6, window_bounds = array<i64: 1, 1, 128>}]} {
    %c0 = arith.constant 0 : index
    %c0_0 = arith.constant 0 : index
    %c0_1 = arith.constant 0 : index
    %0 = vector.load %arg1[%c0, %c0_0, %c0_1] : memref<1x256x128xbf16, #tpu.memory_space<vmem>>, vector<1x256x128xbf16>
    %1 = vector.shape_cast %0 : vector<1x256x128xbf16> to vector<256x128xbf16>
    %c0_2 = arith.constant 0 : index
    %c0_3 = arith.constant 0 : index
    %2 = vector.load %arg2[%c0_2, %c0_3] : memref<128x128xbf16, #tpu.memory_space<vmem>>, vector<128x128xbf16>
    %cst = arith.constant dense<0.000000e+00> : vector<256x128xf32>
    %3 = tpu.matmul %1, %2, %cst {dimension_numbers = #tpu.dot_dimension_numbers<[1], [0], [0], [1], [0, 0, 1, 1], [], []>} : vector<256x128xbf16>, vector<128x128xbf16>, vector<256x128xf32> -> vector<256x128xf32>
    %c0_4 = arith.constant 0 : index
    %c0_5 = arith.constant 0 : index
    %4 = vector.load %arg3[%c0_4, %c0_5] : memref<1x128xf32, #tpu.memory_space<vmem>>, vector<1x128xf32>
    %5 = vector.broadcast %4 : vector<1x128xf32> to vector<256x128xf32>
    %6 = arith.addf %3, %5 : vector<256x128xf32>
    %cst_6 = arith.constant 0.000000e+00 : f32
    %7 = vector.broadcast %cst_6 : f32 to vector<256x128xf32>
    %8 = arith.maximumf %6, %7 : vector<256x128xf32>
    %9 = vector.shape_cast %8 : vector<256x128xf32> to vector<1x256x128xf32>
    %cst_7 = arith.constant dense<0.000000e+00> : vector<1x128xf32>
    %10 = vector.multi_reduction <add>, %9, %cst_7 [1] : vector<1x256x128xf32> to vector<1x128xf32>
    %cst_8 = arith.constant 3.906250e-03 : f32
    %11 = vector.broadcast %cst_8 : f32 to vector<1x128xf32>
    %12 = arith.mulf %10, %11 : vector<1x128xf32>
    %13 = arith.truncf %12 : vector<1x128xf32> to vector<1x128xbf16>
    %c0_9 = arith.constant 0 : index
    %c0_10 = arith.constant 0 : index
    %14 = vector.load %arg4[%c0_9, %c0_10] : memref<128x128xbf16, #tpu.memory_space<vmem>>, vector<128x128xbf16>
    %cst_11 = arith.constant dense<0.000000e+00> : vector<1x128xf32>
    %15 = tpu.matmul %13, %14, %cst_11 {dimension_numbers = #tpu.dot_dimension_numbers<[1], [0], [0], [1], [0, 0, 1, 1], [], []>} : vector<1x128xbf16>, vector<128x128xbf16>, vector<1x128xf32> -> vector<1x128xf32>
    %c0_12 = arith.constant 0 : index
    %c0_13 = arith.constant 0 : index
    %16 = vector.load %arg5[%c0_12, %c0_13] : memref<1x128xf32, #tpu.memory_space<vmem>>, vector<1x128xf32>
    %17 = arith.addf %15, %16 : vector<1x128xf32>
    %c0_14 = arith.constant 0 : index
    %c0_15 = arith.constant 0 : index
    %c0_16 = arith.constant 0 : index
    %18 = vector.load %arg6[%c0_14, %c0_15, %c0_16] : memref<1x1x128xf32, #tpu.memory_space<vmem>>, vector<1x1x128xf32>
    %19 = vector.shape_cast %18 : vector<1x1x128xf32> to vector<1x128xf32>
    %20 = vector.shape_cast %17 : vector<1x128xf32> to vector<1x1x128xf32>
    tpu.vector_store %arg6[%c0_14, %c0_15, %c0_16], %20 {strides = array<i32>} : memref<1x1x128xf32, #tpu.memory_space<vmem>>, vector<1x1x128xf32>,
    %c0_17 = arith.constant 0 : index
    %c0_18 = arith.constant 0 : index
    %c0_19 = arith.constant 0 : index
    %21 = vector.load %arg7[%c0_17, %c0_18, %c0_19] : memref<1x1x128xf32, #tpu.memory_space<vmem>>, vector<1x1x128xf32>
    %22 = vector.shape_cast %21 : vector<1x1x128xf32> to vector<1x128xf32>
    %23 = vector.shape_cast %12 : vector<1x128xf32> to vector<1x1x128xf32>
    tpu.vector_store %arg7[%c0_17, %c0_18, %c0_19], %23 {strides = array<i32>} : memref<1x1x128xf32, #tpu.memory_space<vmem>>, vector<1x1x128xf32>,
    return
  }
  func.func @transform_0(%arg0: i32) -> (i32, i32, i32) {
    %c0_i32 = arith.constant 0 : i32
    %c0_i32_0 = arith.constant 0 : i32
    %c0_i32_1 = arith.constant 0 : i32
    return %arg0, %c0_i32, %c0_i32_0 : i32, i32, i32
  }
  func.func @transform_1(%arg0: i32) -> (i32, i32) {
    %c0_i32 = arith.constant 0 : i32
    %c0_i32_0 = arith.constant 0 : i32
    %c0_i32_1 = arith.constant 0 : i32
    return %c0_i32, %c0_i32_0 : i32, i32
  }
  func.func @transform_2(%arg0: i32) -> (i32, i32) {
    %c0_i32 = arith.constant 0 : i32
    %c0_i32_0 = arith.constant 0 : i32
    %c0_i32_1 = arith.constant 0 : i32
    return %c0_i32, %c0_i32_0 : i32, i32
  }
  func.func @transform_3(%arg0: i32) -> (i32, i32) {
    %c0_i32 = arith.constant 0 : i32
    %c0_i32_0 = arith.constant 0 : i32
    %c0_i32_1 = arith.constant 0 : i32
    return %c0_i32, %c0_i32_0 : i32, i32
  }
  func.func @transform_4(%arg0: i32) -> (i32, i32) {
    %c0_i32 = arith.constant 0 : i32
    %c0_i32_0 = arith.constant 0 : i32
    %c0_i32_1 = arith.constant 0 : i32
    return %c0_i32, %c0_i32_0 : i32, i32
  }
  func.func @transform_5(%arg0: i32) -> (i32, i32, i32) {
    %c0_i32 = arith.constant 0 : i32
    %c0_i32_0 = arith.constant 0 : i32
    %c0_i32_1 = arith.constant 0 : i32
    return %arg0, %c0_i32, %c0_i32_0 : i32, i32, i32
  }
  func.func @transform_6(%arg0: i32) -> (i32, i32, i32) {
    %c0_i32 = arith.constant 0 : i32
    %c0_i32_0 = arith.constant 0 : i32
    %c0_i32_1 = arith.constant 0 : i32
    return %arg0, %c0_i32, %c0_i32_0 : i32, i32, i32
  }
}

</mosaic_0001>

<bundles_post_ra>
// kernel: _student_apply.1
= control target key start
LH: loop header
LB: loop body
LE: loop exit
PB: predicated region body
PF: predicated region fallthrough
CT: control target
= control target key end

     0   :  { %12 = vsyncpa [#allocation3], 0  ;;  %s1507_s0 = inlined_call_operand.vmem [shape: bf16[2,256,128], index: 0, kind: input, shape index: {}]   ;;  %s1508_s1 = inlined_call_operand.vmem [shape: bf16[128,128], index: 1, kind: input, shape index: {}]   ;;  %s1509_s2 = inlined_call_operand.vmem [shape: f32[1,128], index: 2, kind: input, shape index: {}]   ;;  %s1510_s3 = inlined_call_operand.vmem [shape: bf16[128,128], index: 3, kind: input, shape index: {}]   ;;  %s1511_s4 = inlined_call_operand.vmem [shape: f32[1,128], index: 4, kind: input, shape index: {}]   ;;  %s1512_s5 = inlined_call_operand.hbm [shape: f32[2,1,128], index: 5, kind: output, shape index: {0}]   ;;  %s1513_s6 = inlined_call_operand.hbm [shape: f32[2,1,128], index: 6, kind: output, shape index: {1}]  }
   0x1   :  { %14 = vsyncpa [#allocation3 + $0x1], 0 }
   0x2   :  { %15 = vsyncpa [#allocation5], 0 }
   0x3   :  { %17 = vsyncpa [#allocation5 + $0x1], 0  ;;  %s1269_s21 = smov 0   ;;  %s1271_s22 = smov 0  }
   0x4   :  { %s1273_s23 = smov 0   ;;  %s1275_s24 = smov 0  }
   0x5 LB: > { %s1290_s25 = sadd.s32 4294967295, %s1228_s24   ;;  %s911_s26 = sadd.s32 4294967294, %s1228_s24   ;;  %s1228_s24 = sphi %s1275_s24, %s1519_s24   ;;  %s1224_s23 = sphi %s1273_s23, %s1518_s23   ;;  %s1220_s22 = sphi %s1271_s22, %s1517_s22   ;;  %s1216_s21 = sphi %s1269_s21, %s1516_s21  }
   0x6   : > { %s1294_s27 = sadd.s32 1, %s1228_s24   ;;  %s140_s28 = sadd.s32 1, %s1224_s23 }
   0x7   : > { %s137_s29 = ssub.s32 %s1228_s24, %s1294_s27  ;;  %p150_p0 = scmp.ne.s32.totalorder %s1224_s23, %s1220_s22 }
   0x8   : > { %p138_p1 = scmp.eq.s32.totalorder %s137_s29, 0  ;;  %p151_p2 = scmp.eq.s32.totalorder %s1290_s25, 1 }
   0x9   : > { %p156_p3 = scmp.ne.s32.totalorder %s1220_s22, %s1216_s21  ;;  %p157_p4 = scmp.eq.s32.totalorder %s911_s26, 1 }
   0xa   : > { %s1305_s30 = scalar_select %p138_p1, %s1224_s23, %s140_s28  }
   0xb   : > { %p1307_p5 = por %p151_p2, %p150_p0  ;;  %p1311_p6 = por %p157_p4, %p156_p3 }
   0xc   : > { %p914_p7 = scmp.ge.s32.totalorder %s1228_s24, 1  ;;  %p221_p8 = scmp.lt.s32.totalorder %s1228_s24, 3 }
   0xe   : > { %p222_p9 = pnand %p914_p7, %p221_p8 }
   0xf   : > { %v1102_v0 = vld [vmem:[%s1508_s1] sm:$0xff] (!%p222_p9)   ;;  %p254_p10 = scmp.lt.s32.totalorder (!%p222_p9), %s1290_s25, 1  ;;  %v1103_v1 = vld [vmem:[%s1508_s1 + $0x8] sm:$0xff] (!%p222_p9)   ;;  %v1104_v2 = vld [vmem:[%s1508_s1 + $0x10] sm:$0xff] (!%p222_p9)   ;;  %v1230_v25 = vmov (!%p222_p9), 0.0   ;;  %vm1231_vm0 = vmmov (!%p222_p9), 0  }
  0x10   : > { %225 = sbr.rel (%p222_p9) target bundleno = 573 (0x23d), region = 40  ;;  %988 = vmatprep.subr.bf16.mxu0 (!%p222_p9), %v1102_v0  ;;  %v1105_v3 = vld [vmem:[%s1508_s1 + $0x18] sm:$0xff] (!%p222_p9)   ;;  %v1106_v5 = vld [vmem:[%s1508_s1 + $0x20] sm:$0xff] (!%p222_p9)   ;;  %v1107_v6 = vld [vmem:[%s1508_s1 + $0x28] sm:$0xff] (!%p222_p9)   ;;  %1036 = vmatprep.subr.bf16.mxu1 (!%p222_p9), %v1230_v25  ;;  %s1426_s18 = sand.u32 (!%p222_p9), 1, %s1220_s22  }
  0x11   : > { %989 = vmatpush3.bf16.msra.mxu0 (!%p222_p9), %v1102_v0  ;;  %v1108_v7 = vld [vmem:[%s1508_s1 + $0x30] sm:$0xff] (!%p222_p9)   ;;  %v1109_v8 = vld [vmem:[%s1508_s1 + $0x38] sm:$0xff] (!%p222_p9)   ;;  %v1126_v24 = vld [vmem:[%s1510_s3] sm:$0xff] (!%p222_p9)   ;;  %1052 = vmatprep.mubr.msk.bf16.mxu1 (!%p222_p9), %vm1231_vm0, %v1230_v25  ;;  %s253_s20 = scalar_lea.vmem (!%p222_p9), [#allocation4], %s1426_s18  ;;  %s950_s26 = sshll.u32 (!%p222_p9), %s1290_s25, 4 }
  0x12   : > { %990 = vmatprep.subr.bf16.mxu0 (!%p222_p9), %v1103_v1  ;;  %1037 = vmatpush3.bf16.msra.mxu1 (!%p222_p9), %v1126_v24  ;;  %v1127_v26 = vld [vmem:[%s1510_s3 + $0x8] sm:$0xff] (!%p222_p9)   ;;  %v1128_v27 = vld [vmem:[%s1510_s3 + $0x10] sm:$0xff] (!%p222_p9)   ;;  %v1129_v28 = vld [vmem:[%s1510_s3 + $0x18] sm:$0xff] (!%p222_p9)   ;;  %s1435_s29 = scalar_lea.hbm (!%p222_p9), %s1513_s6, %s950_s26  ;;  %s828_s9 = sshll.u32 (!%p222_p9), %s253_s20, 4  ;;  %s829_s9 = int_to_ptr.vmem [resolvable:$true] %s828_s9 }
  0x13   : > { %1038 = vmatprep.subr.bf16.mxu1 (!%p222_p9), %v1230_v25  ;;  %v1130_v29 = vld [vmem:[%s1510_s3 + $0x20] sm:$0xff] (!%p222_p9)   ;;  %v1131_v30 = vld [vmem:[%s1510_s3 + $0x28] sm:$0xff] (!%p222_p9)   ;;  %v1132_v31 = vld [vmem:[%s1510_s3 + $0x30] sm:$0xff] (!%p222_p9)   ;;  %s803_s10 = scalar_lea.sflag (!%p222_p9), [#allocation5], %s1426_s18  ;;  %s1134_s11 = scalar_lea.vmem (!%p222_p9), %s829_s9, 16 }
  0x14   : > { %v1133_v32 = vld [vmem:[%s1510_s3 + $0x38] sm:$0xff] (!%p222_p9)   ;;  %v1391_v33 = vld [vmem:[%s1509_s2] ss:$0 sm:$0xff] (!%p222_p9)  ;;  %p1135_p11 = scmp.ne.s32.totalorder (!%p222_p9), %s829_s9, %s1134_s11  ;;  %s1232_s12 = smov (!%p222_p9), [#allocation4]  }
  0x15   : > { %991 = vmatpush3.bf16.msra.mxu0 (!%p222_p9), %v1103_v1 }
  0x16   : > { %992 = vmatprep.subr.bf16.mxu0 (!%p222_p9), %v1104_v2  ;;  %1039 = vmatpush3.bf16.msra.mxu1 (!%p222_p9), %v1127_v26  ;;  %p1136_p12 = pnand (!%p222_p9), %p1135_p11, %p1307_p5 }
  0x17   : > { %s255_s13 = scalar_select %p254_p10, %s1290_s25, 1  ;;  %1040 = vmatprep.subr.bf16.mxu1 %v1230_v25 }
  0x18   : > { %p1137_p13 = pneg %p1136_p12 }
  0x19   : > { %s954_s16 = sshll.u32 %s255_s13, 7  ;;  %993 = vmatpush3.bf16.msra.mxu0 %v1104_v2  ;;  %s1138_s13 = sshll.u32 %s1232_s12, 4  ;;  %s1139_s13 = int_to_ptr.vmem [resolvable:$false] %s1138_s13 }
  0x1a   : > { %s1331_s19 = scalar_lea.vmem %s1507_s0, %s954_s16  ;;  %994 = vmatprep.subr.bf16.mxu0 %v1105_v3  ;;  %1041 = vmatpush3.bf16.msra.mxu1 %v1128_v27  ;;  %s1140_s14 = scalar_lea.vmem %s1139_s13, 32 }
  0x1b   : > { %v1110_v4 = vld [vmem:[%s1331_s19] sm:$0xff]   ;;  %v1111_v9 = vld [vmem:[%s1331_s19 + $0x8] sm:$0xff]   ;;  %v1112_v10 = vld [vmem:[%s1331_s19 + $0x10] sm:$0xff]   ;;  %1042 = vmatprep.subr.bf16.mxu1 %v1230_v25  ;;  %p1141_p0 = scmp.lt.s32.totalorder %s829_s9, %s1139_s13  ;;  %p1142_p1 = scmp.lt.s32.totalorder %s1140_s14, %s1134_s11 }
  0x1c   : > { %1004 = vmatprep.mubr.bf16.mxu0 %v1110_v4  ;;  %v1113_v11 = vld [vmem:[%s1331_s19 + $0x18] sm:$0xff]   ;;  %v1114_v12 = vld [vmem:[%s1331_s19 + $0x20] sm:$0xff]   ;;  %v1115_v13 = vld [vmem:[%s1331_s19 + $0x28] sm:$0xff]  }
  0x1d   : > { %995 = vmatpush3.bf16.msra.mxu0 %v1105_v3  ;;  %v1116_v14 = vld [vmem:[%s1331_s19 + $0x30] sm:$0xff]   ;;  %v1117_v15 = vld [vmem:[%s1331_s19 + $0x38] sm:$0xff]   ;;  %v1118_v16 = vld [vmem:[%s1331_s19 + $0x40] sm:$0xff]   ;;  %p1143_p2 = por %p1142_p1, %p1141_p0 }
  0x1e   : > { %996 = vmatprep.subr.bf16.mxu0 %v1106_v5  ;;  %v1119_v17 = vld [vmem:[%s1331_s19 + $0x48] sm:$0xff]   ;;  %v1120_v18 = vld [vmem:[%s1331_s19 + $0x50] sm:$0xff]   ;;  %v1121_v19 = vld [vmem:[%s1331_s19 + $0x58] sm:$0xff]   ;;  %1043 = vmatpush3.bf16.msra.mxu1 %v1129_v28 }
  0x1f   : > { %v1122_v20 = vld [vmem:[%s1331_s19 + $0x60] sm:$0xff]   ;;  %v1123_v21 = vld [vmem:[%s1331_s19 + $0x68] sm:$0xff]   ;;  %v1124_v22 = vld [vmem:[%s1331_s19 + $0x70] sm:$0xff]   ;;  %1044 = vmatprep.subr.bf16.mxu1 %v1230_v25  ;;  %p1144_p3 = pnand %p1143_p2, %p1137_p13 }
  0x20   : > { %v1125_v23 = vld [vmem:[%s1331_s19 + $0x78] sm:$0xff]  }
  0x21   : > { %997 = vmatpush3.bf16.msra.mxu0 %v1106_v5 }
  0x22   : > { %998 = vmatprep.subr.bf16.mxu0 %v1107_v6  ;;  %1045 = vmatpush3.bf16.msra.mxu1 %v1130_v29 }
  0x23   : > { %1046 = vmatprep.subr.bf16.mxu1 %v1230_v25 }
  0x25   : > { %999 = vmatpush3.bf16.msra.mxu0 %v1107_v6 }
  0x26   : > { %1000 = vmatprep.subr.bf16.mxu0 %v1108_v7  ;;  %1047 = vmatpush3.bf16.msra.mxu1 %v1131_v30 }
  0x27   : > { %1048 = vmatprep.subr.bf16.mxu1 %v1230_v25 }
  0x29   : > { %1001 = vmatpush3.bf16.msra.mxu0 %v1108_v7 }
  0x2a   : > { %1002 = vmatprep.subr.bf16.mxu0 %v1109_v8  ;;  %1049 = vmatpush3.bf16.msra.mxu1 %v1132_v31 }
  0x2b   : > { %1050 = vmatprep.subr.bf16.mxu1 %v1230_v25 }
  0x2d   : > { %1003 = vmatpush3.bf16.msra.mxu0 %v1109_v8 }
  0x2e   : > { %1051 = vmatpush3.bf16.msra.mxu1 %v1133_v32 }
  0x30   : > { %1005 = vmatmul.mubr.bf16.vlgmr.msra.gmra.mrb[0].mxu0 %v1111_v9 }
  0x31   : > { %1008 = vmatprep.mubr.bf16.mxu0 %v1112_v10 }
  0x38   : > { %1009 = vmatmul.mubr.bf16.gmra.mrb[4].mxu0 %v1113_v11 }
  0x39   : > { %1012 = vmatprep.mubr.bf16.mxu0 %v1114_v12 }
  0x40   : > { %1013 = vmatmul.mubr.bf16.gmra.mrb[8].mxu0 %v1115_v13 }
  0x41   : > { %1016 = vmatprep.mubr.bf16.mxu0 %v1116_v14 }
  0x48   : > { %1017 = vmatmul.mubr.bf16.gmra.mrb[12].mxu0 %v1117_v15 }
  0x49   : > { %1020 = vmatprep.mubr.bf16.mxu0 %v1118_v16 }
  0x50   : > { %1021 = vmatmul.mubr.bf16.gmra.mrb[16].mxu0 %v1119_v17 }
  0x51   : > { %1024 = vmatprep.mubr.bf16.mxu0 %v1120_v18 }
  0x58   : > { %1025 = vmatmul.mubr.bf16.gmra.mrb[20].mxu0 %v1121_v19 }
  0x59   : > { %1028 = vmatprep.mubr.bf16.mxu0 %v1122_v20 }
  0x60   : > { %1029 = vmatmul.mubr.bf16.gmra.mrb[24].mxu0 %v1123_v21 }
  0x61   : > { %1032 = vmatprep.mubr.bf16.mxu0 %v1124_v22 }
  0x68   : > { %1033 = vmatmul.mubr.bf16.gmra.mrb[28].mxu0 %v1125_v23 }
 0x103   : > { %v1006_v34 = vpop.f32.mrb[0].mxu0 }
 0x104   : > { %v493_v35 = vpop.f32.mrb[1].mxu0  ;;  %v502_v39 = vadd.f32 %v1006_v34, %v1391_v33 }
 0x105   : > { %v494_v36 = vadd.f32 %v1391_v33, %v493_v35  ;;  %v1007_v37 = vpop.f32.mrb[2].mxu0 }
 0x106   : > { %v496_v38 = vpop.f32.mrb[3].mxu0  ;;  %v505_v42 = vadd.f32 %v1007_v37, %v1391_v33  ;;  %v622_v44 = vmax.f32 %v502_v39, 0.0 }
 0x107   : > { %v497_v40 = vadd.f32 %v1391_v33, %v496_v38  ;;  %v620_v41 = vmax.f32 %v494_v36, 0.0 }
 0x108   : > { %v623_v48 = vmax.f32 %v505_v42, 0.0 }
 0x109   : > { %v621_v43 = vmax.f32 %v497_v40, 0.0 }
 0x10b   : > { %v652_v45 = vadd.f32 %v621_v43, %v620_v41  ;;  %v1010_v46 = vpop.f32.mrb[4].mxu0 }
 0x10c   : > { %v509_v47 = vpop.f32.mrb[5].mxu0  ;;  %v518_v53 = vadd.f32 %v1010_v46, %v1391_v33 }
 0x10d   : > { %v653_v49 = vadd.f32 %v652_v45, %v622_v44  ;;  %v510_v50 = vadd.f32 %v1391_v33, %v509_v47  ;;  %v1011_v51 = vpop.f32.mrb[6].mxu0 }
 0x10e   : > { %v512_v52 = vpop.f32.mrb[7].mxu0  ;;  %v521_v58 = vadd.f32 %v1011_v51, %v1391_v33  ;;  %v626_v60 = vmax.f32 %v518_v53, 0.0 }
 0x10f   : > { %v624_v54 = vmax.f32 %v510_v50, 0.0  ;;  %v654_v55 = vadd.f32 %v653_v49, %v623_v48  ;;  %v513_v56 = vadd.f32 %v1391_v33, %v512_v52 }
 0x110   : > { %v627_v0 = vmax.f32 %v521_v58, 0.0 }
 0x111   : > { %v655_v57 = vadd.f32 %v654_v55, %v624_v54  ;;  %v625_v59 = vmax.f32 %v513_v56, 0.0 }
 0x113   : > { %v656_v61 = vadd.f32 %v655_v57, %v625_v59  ;;  %v1014_v62 = vpop.f32.mrb[8].mxu0 }
 0x114   : > { %v525_v63 = vpop.f32.mrb[9].mxu0  ;;  %v534_v5 = vadd.f32 %v1014_v62, %v1391_v33 }
 0x115   : > { %v657_v1 = vadd.f32 %v656_v61, %v626_v60  ;;  %v526_v2 = vadd.f32 %v1391_v33, %v525_v63  ;;  %v1015_v3 = vpop.f32.mrb[10].mxu0 }
 0x116   : > { %v528_v4 = vpop.f32.mrb[11].mxu0  ;;  %v537_v10 = vadd.f32 %v1015_v3, %v1391_v33  ;;  %v630_v12 = vmax.f32 %v534_v5, 0.0 }
 0x117   : > { %v628_v6 = vmax.f32 %v526_v2, 0.0  ;;  %v658_v7 = vadd.f32 %v657_v1, %v627_v0  ;;  %v529_v8 = vadd.f32 %v1391_v33, %v528_v4 }
 0x118   : > { %v631_v16 = vmax.f32 %v537_v10, 0.0 }
 0x119   : > { %v659_v9 = vadd.f32 %v658_v7, %v628_v6  ;;  %v629_v11 = vmax.f32 %v529_v8, 0.0 }
 0x11b   : > { %v660_v13 = vadd.f32 %v659_v9, %v629_v11  ;;  %v1018_v14 = vpop.f32.mrb[12].mxu0 }
 0x11c   : > { %v541_v15 = vpop.f32.mrb[13].mxu0  ;;  %v550_v21 = vadd.f32 %v1018_v14, %v1391_v33 }
 0x11d   : > { %v661_v17 = vadd.f32 %v660_v13, %v630_v12  ;;  %v542_v18 = vadd.f32 %v1391_v33, %v541_v15  ;;  %v1019_v19 = vpop.f32.mrb[14].mxu0 }
 0x11e   : > { %v544_v20 = vpop.f32.mrb[15].mxu0  ;;  %v553_v26 = vadd.f32 %v1019_v19, %v1391_v33  ;;  %v634_v28 = vmax.f32 %v550_v21, 0.0 }
 0x11f   : > { %v632_v22 = vmax.f32 %v542_v18, 0.0  ;;  %v662_v23 = vadd.f32 %v661_v17, %v631_v16  ;;  %v545_v24 = vadd.f32 %v1391_v33, %v544_v20 }
 0x120   : > { %v635_v32 = vmax.f32 %v553_v26, 0.0 }
 0x121   : > { %v663_v25 = vadd.f32 %v662_v23, %v632_v22  ;;  %v633_v27 = vmax.f32 %v545_v24, 0.0 }
 0x123   : > { %v664_v29 = vadd.f32 %v663_v25, %v633_v27  ;;  %v1022_v30 = vpop.f32.mrb[16].mxu0 }
 0x124   : > { %v557_v31 = vpop.f32.mrb[17].mxu0  ;;  %v566_v38 = vadd.f32 %v1022_v30, %v1391_v33 }
 0x125   : > { %v665_v34 = vadd.f32 %v664_v29, %v634_v28  ;;  %v558_v35 = vadd.f32 %v1391_v33, %v557_v31  ;;  %v1023_v36 = vpop.f32.mrb[18].mxu0 }
 0x126   : > { %v560_v37 = vpop.f32.mrb[19].mxu0  ;;  %v569_v43 = vadd.f32 %v1023_v36, %v1391_v33  ;;  %v638_v45 = vmax.f32 %v566_v38, 0.0 }
 0x127   : > { %v636_v39 = vmax.f32 %v558_v35, 0.0  ;;  %v666_v40 = vadd.f32 %v665_v34, %v635_v32  ;;  %v561_v41 = vadd.f32 %v1391_v33, %v560_v37 }
 0x128   : > { %v639_v49 = vmax.f32 %v569_v43, 0.0 }
 0x129   : > { %v667_v42 = vadd.f32 %v666_v40, %v636_v39  ;;  %v637_v44 = vmax.f32 %v561_v41, 0.0 }
 0x12b   : > { %v668_v46 = vadd.f32 %v667_v42, %v637_v44  ;;  %v1026_v47 = vpop.f32.mrb[20].mxu0 }
 0x12c   : > { %v573_v48 = vpop.f32.mrb[21].mxu0  ;;  %v582_v54 = vadd.f32 %v1026_v47, %v1391_v33 }
 0x12d   : > { %v669_v50 = vadd.f32 %v668_v46, %v638_v45  ;;  %v574_v51 = vadd.f32 %v1391_v33, %v573_v48  ;;  %v1027_v52 = vpop.f32.mrb[22].mxu0 }
 0x12e   : > { %v576_v53 = vpop.f32.mrb[23].mxu0  ;;  %v585_v59 = vadd.f32 %v1027_v52, %v1391_v33  ;;  %v642_v61 = vmax.f32 %v582_v54, 0.0 }
 0x12f   : > { %v640_v55 = vmax.f32 %v574_v51, 0.0  ;;  %v670_v56 = vadd.f32 %v669_v50, %v639_v49  ;;  %v577_v57 = vadd.f32 %v1391_v33, %v576_v53 }
 0x130   : > { %v643_v1 = vmax.f32 %v585_v59, 0.0 }
 0x131   : > { %v671_v58 = vadd.f32 %v670_v56, %v640_v55  ;;  %v641_v60 = vmax.f32 %v577_v57, 0.0 }
 0x133   : > { %v672_v62 = vadd.f32 %v671_v58, %v641_v60  ;;  %v1030_v63 = vpop.f32.mrb[24].mxu0 }
 0x134   : > { %v589_v0 = vpop.f32.mrb[25].mxu0  ;;  %v598_v6 = vadd.f32 %v1030_v63, %v1391_v33 }
 0x135   : > { %v673_v2 = vadd.f32 %v672_v62, %v642_v61  ;;  %v590_v3 = vadd.f32 %v1391_v33, %v589_v0  ;;  %v1031_v4 = vpop.f32.mrb[26].mxu0 }
 0x136   : > { %v592_v5 = vpop.f32.mrb[27].mxu0  ;;  %v601_v11 = vadd.f32 %v1031_v4, %v1391_v33  ;;  %v646_v13 = vmax.f32 %v598_v6, 0.0 }
 0x137   : > { %v644_v7 = vmax.f32 %v590_v3, 0.0  ;;  %v674_v8 = vadd.f32 %v673_v2, %v643_v1  ;;  %v593_v9 = vadd.f32 %v1391_v33, %v592_v5 }
 0x138   : > { %v647_v17 = vmax.f32 %v601_v11, 0.0 }
 0x139   : > { %v675_v10 = vadd.f32 %v674_v8, %v644_v7  ;;  %v645_v12 = vmax.f32 %v593_v9, 0.0 }
 0x13b   : > { %v676_v14 = vadd.f32 %v675_v10, %v645_v12  ;;  %v1034_v15 = vpop.f32.mrb[28].mxu0 }
 0x13c   : > { %v605_v16 = vpop.f32.mrb[29].mxu0  ;;  %v614_v22 = vadd.f32 %v1034_v15, %v1391_v33 }
 0x13d   : > { %v677_v18 = vadd.f32 %v676_v14, %v646_v13  ;;  %v606_v19 = vadd.f32 %v1391_v33, %v605_v16  ;;  %v1035_v20 = vpop.f32.mrb[30].mxu0 }
 0x13e   : > { %v608_v21 = vpop.f32.mrb[31].mxu0  ;;  %v617_v27 = vadd.f32 %v1035_v20, %v1391_v33  ;;  %v650_v29 = vmax.f32 %v614_v22, 0.0 }
 0x13f   : > { %v648_v23 = vmax.f32 %v606_v19, 0.0  ;;  %v678_v24 = vadd.f32 %v677_v18, %v647_v17  ;;  %v609_v25 = vadd.f32 %v1391_v33, %v608_v21 }
 0x140   : > { %v651_v31 = vmax.f32 %v617_v27, 0.0 }
 0x141   : > { %v679_v26 = vadd.f32 %v678_v24, %v648_v23  ;;  %v649_v28 = vmax.f32 %v609_v25, 0.0 }
 0x143   : > { %v680_v30 = vadd.f32 %v679_v26, %v649_v28 }
 0x145   : > { %v681_v32 = vadd.f32 %v680_v30, %v650_v29 }
 0x147   : > { %v682_v34 = vadd.f32 %v681_v32, %v651_v31 }
 0x149   : > { %v683_v35 = vrot.slane %v682_v34, 4 }
 0x14b   : > { %v684_v36 = vadd.f32 %v683_v35, %v682_v34 }
 0x14d   : > { %v685_v37 = vrot.slane %v684_v36, 2 }
 0x14f   : > { %v686_v38 = vadd.f32 %v685_v37, %v684_v36 }
 0x151   : > { %v687_v39 = vrot.slane %v686_v38, 1 }
 0x153   : > { %v688_v40 = vadd.f32 %v687_v39, %v686_v38 }
 0x155   : > { %v689_v33 = vmul.f32 0.00390625, %v688_v40 }
 0x157   : > { %v690_v41 = vpack.c.bf16 %v689_v33, %v689_v33  ;;  %797 = vst [vmem:[%s253_s20] sm:$0x1] %v689_v33 }
 0x159   : > { %1053 = vmatmul.mubr.bf16.vlgmr.msra.gmra.mrb[0].mxu1 %v690_v41 }
 0x15a   : > { %1147 = shalt.err (!%p1144_p3)
}
 0x15b   : > { %s1148_s15 = scalar_lea.hbm %s1435_s29, 16  ;;  %s1152_s20 = scalar_lea.hbm %s1513_s6, 32 }
 0x15c   : > { %p1149_p4 = scmp.ne.s32.totalorder %s1435_s29, %s1148_s15  ;;  %p1153_p9 = scmp.lt.u32.totalorder %s1435_s29, %s1513_s6 }
 0x15d   : > { %p1154_p10 = scmp.lt.u32.totalorder %s1152_s20, %s1148_s15  ;;  %p1156_p12 = scmp.lt.u32.totalorder %s1148_s15, %s1435_s29 }
 0x15e   : > { %p1150_p7 = pnand %p1149_p4, %p1307_p5 }
 0x15f   : > { %p1155_p11 = por %p1154_p10, %p1153_p9 }
 0x160   : > { %p1151_p8 = pneg %p1150_p7 }
 0x161   : > { %p1157_p13 = por %p1156_p12, %p1155_p11 }
 0x163   : > { %p1158_p0 = pnand %p1157_p13, %p1151_p8 }
 0x165   : > { %1161 = shalt.err (!%p1158_p0)
}
 0x166   : > { %1057 = dma.vmem_to_hbm [thread:$0]  (%p1307_p5), %s829_s9, 16, %s1435_s29, %s803_s10   ;;  %v707_v42 = vld [vmem:[%s1511_s4] sm:$0x1] }
 0x167   : > { %s247_s13 = scalar_lea.vmem [#allocation2], %s1426_s18  ;;  %s1464_s17 = scalar_lea.hbm %s1512_s5, %s950_s26 }
 0x168   : > { %s815_s14 = sshll.u32 %s247_s13, 4  ;;  %s799_s29 = scalar_lea.sflag [#allocation3], %s1426_s18  ;;  %s1466_s14 = int_to_ptr.vmem [resolvable:$true] %s815_s14 }
 0x169   : > { %s1162_s9 = scalar_lea.vmem %s1466_s14, 16  ;;  %s1233_s25 = smov [#allocation2]  }
 0x16a   : > { %p1163_p1 = scmp.ne.s32.totalorder %s1466_s14, %s1162_s9  ;;  %s1166_s10 = sshll.u32 %s1233_s25, 4  ;;  %s1167_s10 = int_to_ptr.vmem [resolvable:$false] %s1166_s10 }
 0x16b   : > { %s1168_s20 = scalar_lea.vmem %s1167_s10, 32  ;;  %p1169_p4 = scmp.lt.s32.totalorder %s1466_s14, %s1167_s10 }
 0x16c   : > { %p1164_p2 = pnand %p1163_p1, %p1307_p5  ;;  %p1170_p7 = scmp.lt.s32.totalorder %s1168_s20, %s1162_s9 }
 0x16e   : > { %p1165_p3 = pneg %p1164_p2  ;;  %p1171_p8 = por %p1170_p7, %p1169_p4 }
 0x170   : > { %p1172_p9 = pnand %p1171_p8, %p1165_p3 }
 0x22c   : > { %v790_v43 = vpop.f32.mrb[0].mxu1 }
 0x22d   : > { %v791_v44 = vadd.f32 %v790_v43, %v707_v42  ;;  %v1054_v45 = vpop.f32.mrb[1].mxu1 }
 0x22e   : > { %v793_v46 = vpop.f32.mrb[2].mxu1 }
 0x22f   : > { %796 = vst [vmem:[%s247_s13] sm:$0x1] %v791_v44  ;;  %v1055_v47 = vpop.f32.mrb[3].mxu1 }
 0x230   : > { %1175 = shalt.err (!%p1172_p9)
}
 0x231   : > { %s1176_s18 = scalar_lea.hbm %s1464_s17, 16  ;;  %s1180_s28 = scalar_lea.hbm %s1512_s5, 32 }
 0x232   : > { %p1177_p10 = scmp.ne.s32.totalorder %s1464_s17, %s1176_s18  ;;  %p1181_p13 = scmp.lt.u32.totalorder %s1464_s17, %s1512_s5 }
 0x233   : > { %p1182_p0 = scmp.lt.u32.totalorder %s1180_s28, %s1176_s18  ;;  %p1184_p2 = scmp.lt.u32.totalorder %s1176_s18, %s1464_s17 }
 0x234   : > { %p1178_p11 = pnand %p1177_p10, %p1307_p5 }
 0x235   : > { %p1183_p1 = por %p1182_p0, %p1181_p13 }
 0x236   : > { %p1179_p12 = pneg %p1178_p11 }
 0x237   : > { %p1185_p3 = por %p1184_p2, %p1183_p1 }
 0x239   : > { %p1186_p4 = pnand %p1185_p3, %p1179_p12 }
 0x23b   : > { %1189 = shalt.err (!%p1186_p4)
}
 0x23c   : > { %1056 = dma.vmem_to_hbm [thread:$0]  (%p1307_p5), %s1466_s14, 16, %s1464_s17, %s799_s29  }
 0x23d PF: > { %p1067_p7 = scmp.ge.s32.totalorder %s1228_s24, 2  ;;  %s840_s13 = sand.u32 1, %s1216_s21  }
 0x23e   : > { %s841_s15 = scalar_lea.sflag [#allocation3], %s840_s13 }
 0x23f   : > { %p1061_p8 = pnand %p1067_p7, %p1311_p6 }
 0x241   : > { %1207 = dma.done.wait (!%p1061_p8), %s841_s15, 16  }
 0x242   : > { %1209 = vsyncadd (!%p1061_p8), %s841_s15, 4294967280  ;;  %s849_s16 = scalar_lea.sflag [#allocation5], %s840_s13 }
 0x243   : > { %1211 = dma.done.wait (!%p1061_p8), %s849_s16, 16  }
 0x244   : > { %1213 = vsyncadd (!%p1061_p8), %s849_s16, 4294967280  ;;  %p20_p5 = scmp.ge.s32.totalorder %s1294_s27, 4   ;;  %s1516_s21 = smov %s1220_s22 }
 0x245   : > { %s1517_s22 = smov %s1224_s23  ;;  %s1518_s23 = smov %s1305_s30 }
 0x246   : > { %s1519_s24 = smov %s1294_s27  ;;  %22 = sbr.rel (!%p20_p5) target bundleno = 5 (0x5), region = 92 }
 0x24d   :  { %853 = vsyncpa [#allocation3], 1 }
 0x24e   :  { %855 = vsyncpa [#allocation3 + $0x1], 1 }
 0x24f   :  { %856 = vsyncpa [#allocation5], 1 }
 0x250   :  { %858 = vsyncpa [#allocation5 + $0x1], 1 }

</bundles_post_ra>
